<compile_context>
chip_gen: v7x
topology: tpu7x:2x2x1
jax: 0.10.0
libtpu: 0.0.40
codegen_flags: <defaults>
</compile_context>

<pallas_src>
import functools

import jax
import jax.numpy as jnp
from jax import lax
from jax.experimental import pallas as pl
from jax.experimental.pallas import tpu as pltpu


def _kd_block_kernel(student_ref, teacher_ref, labels_ref, out_ref, *,
                     temperature, inv_temperature, int_temperature,
                     n_valid_rows, block_rows):
    i = pl.program_id(0)

    s = student_ref[...].astype(jnp.float32)   # (TB, C)
    t = teacher_ref[...].astype(jnp.float32)   # (TB, C)
    labels = labels_ref[...]                   # (TB, 1) int32

    # Rows beyond the original N are zero-padding -> masked out of both losses.
    row_ids = lax.broadcasted_iota(jnp.int32, (block_rows, 1), 0)
    valid = (i * block_rows + row_ids) < n_valid_rows                 # (TB, 1)

    # ---- temperature-scaled log-softmax (multiply by 1/T; no per-element divides) ----
    sT = s * inv_temperature
    tT = t * inv_temperature

    sT_max = jnp.max(sT, axis=-1, keepdims=True)                      # (TB, 1)
    exp_sT = jnp.exp(sT - sT_max)                                     # EUP pass 1
    sum_sT = jnp.sum(exp_sT, axis=-1, keepdims=True)
    s_lp = (sT - sT_max) - jnp.log(sum_sT)                            # log_softmax(s/T)

    tT_max = jnp.max(tT, axis=-1, keepdims=True)
    exp_tT = jnp.exp(tT - tT_max)                                     # EUP pass 2
    sum_tT = jnp.sum(exp_tT, axis=-1, keepdims=True)
    t_lp = (tT - tT_max) - jnp.log(sum_tT)                            # log_softmax(t/T)
    t_p = exp_tT * (1.0 / sum_tT)                                     # softmax(t/T), reuses exp_tT

    # KL(teacher || student), log_target=True: sum p_t * (log p_t - log p_s)
    soft_row = jnp.sum(t_p * (t_lp - s_lp), axis=-1, keepdims=True)   # (TB, 1)

    # ---- hard loss: cross-entropy on raw student logits ----
    # s - max(s) = T * (sT - sT_max); for a small integer T reuse exp_sT via VPU
    # multiplies instead of another full EUP exp pass.
    s_max = temperature * sT_max
    if int_temperature is not None:
        exp_s = exp_sT
        for _ in range(int_temperature - 1):
            exp_s = exp_s * exp_sT                                    # exp_sT ** T
    else:
        exp_s = jnp.exp(s - s_max)
    lse_s = jnp.log(jnp.sum(exp_s, axis=-1, keepdims=True)) + s_max   # (TB, 1)

    col_ids = lax.broadcasted_iota(jnp.int32, s.shape, 1)
    picked = jnp.sum(jnp.where(col_ids == labels, s, 0.0), axis=-1, keepdims=True)
    hard_row = lse_s - picked                                         # (TB, 1)

    soft_part = jnp.sum(jnp.where(valid, soft_row, 0.0))
    hard_part = jnp.sum(jnp.where(valid, hard_row, 0.0))

    # Lane-dense (8, 128) partial tile: column 0 = soft partial, column 1 = hard partial.
    out_col = lax.broadcasted_iota(jnp.int32, (8, 128), 1)
    out_ref[...] = jnp.where(out_col == 0, soft_part,
                             jnp.where(out_col == 1, hard_part, 0.0))


def _round_up(x, m):
    return (x + m - 1) // m * m


def _pick_block_rows(n_rows, n_cols):
    # Size tiles so 2 inputs x 2 pipeline buffers of f32 stay <= ~6 MiB, leaving
    # headroom for f32 intermediates on every generation (v5e/v6e 128 MiB VMEM,
    # v7x 64 MiB; default scoped limits as low as 16 MiB on v5e).
    dbuf_budget_bytes = 6 * 1024 * 1024
    per_row_bytes = 2 * 2 * n_cols * 4
    rows = dbuf_budget_bytes // per_row_bytes
    rows = max(8, min(1024, rows))
    rows = (rows // 8) * 8
    rows = min(rows, _round_up(n_rows, 8))
    return int(max(8, rows))


def knowledge_distillation_loss(student_logits, teacher_logits, labels,
                                temperature=2.0, alpha=0.5, block_rows=None):
    """Matches PyTorch KnowledgeDistillationLoss.forward semantics."""
    C = student_logits.shape[-1]
    # KLDivLoss(reduction='batchmean') divides the total sum by size(0) of the
    # (unflattened) log-prob tensor; CrossEntropyLoss averages over flattened rows.
    soft_div = float(student_logits.shape[0])
    s2 = student_logits.reshape(-1, C)
    t2 = teacher_logits.reshape(-1, C)
    l2 = labels.reshape(-1, 1).astype(jnp.int32)
    N = s2.shape[0]
    hard_div = float(N)

    if block_rows is None:
        block_rows = _pick_block_rows(N, C)
    block_rows = max(8, (int(block_rows) // 8) * 8)

    Np = _round_up(N, block_rows)
    if Np != N:
        s2 = jnp.pad(s2, ((0, Np - N), (0, 0)))
        t2 = jnp.pad(t2, ((0, Np - N), (0, 0)))
        l2 = jnp.pad(l2, ((0, Np - N), (0, 0)))
    num_blocks = Np // block_rows

    temperature = float(temperature)
    int_temperature = (int(temperature)
                       if temperature.is_integer() and 1.0 <= temperature <= 4.0
                       else None)

    kernel = functools.partial(
        _kd_block_kernel,
        temperature=temperature,
        inv_temperature=1.0 / temperature,
        int_temperature=int_temperature,
        n_valid_rows=N,
        block_rows=block_rows,
    )

    partials = pl.pallas_call(
        kernel,
        out_shape=jax.ShapeDtypeStruct((num_blocks * 8, 128), jnp.float32),
        grid_spec=pltpu.PrefetchScalarGridSpec(
            num_scalar_prefetch=0,
            grid=(num_blocks,),
            in_specs=[
                pl.BlockSpec((block_rows, C), lambda i: (i, 0)),
                pl.BlockSpec((block_rows, C), lambda i: (i, 0)),
                pl.BlockSpec((block_rows, 1), lambda i: (i, 0)),
            ],
            out_specs=pl.BlockSpec((8, 128), lambda i: (i, 0)),
        ),
        compiler_params=pltpu.CompilerParams(
            dimension_semantics=("parallel",),      # per-block partials -> both TCs on v7x
            vmem_limit_bytes=32 * 1024 * 1024,
        ),
    )(s2, t2, l2)

    parts = partials.reshape(num_blocks, 8, 128)
    soft_sum = jnp.sum(parts[:, 0, 0])
    hard_sum = jnp.sum(parts[:, 0, 1])

    soft_scale = alpha * temperature * temperature / soft_div   # KLDiv 'batchmean' * T^2 * alpha
    hard_scale = (1.0 - alpha) / hard_div                       # CE 'mean' * (1 - alpha)
    return soft_scale * soft_sum + hard_scale * hard_sum


def _reference(student_logits, teacher_logits, labels, temperature=2.0, alpha=0.5):
    C = student_logits.shape[-1]
    t_lp = jax.nn.log_softmax(teacher_logits / temperature, axis=-1)
    s_lp = jax.nn.log_softmax(student_logits / temperature, axis=-1)
    soft = jnp.sum(jnp.exp(t_lp) * (t_lp - s_lp)) / student_logits.shape[0] * temperature ** 2
    s2 = student_logits.reshape(-1, C)
    l2 = labels.reshape(-1)
    log_p = jax.nn.log_softmax(s2, axis=-1)
    hard = -jnp.mean(jnp.take_along_axis(log_p, l2[:, None], axis=-1))
    return alpha * soft + (1.0 - alpha) * hard


if __name__ == "__main__":
    key = jax.random.PRNGKey(0)
    k1, k2, k3 = jax.random.split(key, 3)
    N, C = 16, 128                      # batch rows, number of classes
    student = jax.random.normal(k1, (N, C), dtype=jnp.float32)
    teacher = jax.random.normal(k2, (N, C), dtype=jnp.float32)
    labels = jax.random.randint(k3, (N,), 0, C, dtype=jnp.int32)

    loss = knowledge_distillation_loss(student, teacher, labels,
                                       temperature=2.0, alpha=0.5)
    loss = jax.block_until_ready(loss)

    ref = _reference(student, teacher, labels, temperature=2.0, alpha=0.5)
    assert jnp.allclose(loss, ref, rtol=1e-5, atol=1e-5), (loss, ref)
    print("KERNEL_OK")
</pallas_src>

<mosaic_0001>
module attributes {stable_mosaic.version = 11 : i64} {
  func.func @_kd_block_kernel(%arg0: i32, %arg1: memref<16x128xf32, #tpu.memory_space<vmem>>, %arg2: memref<16x128xf32, #tpu.memory_space<vmem>>, %arg3: memref<16x1xi32, #tpu.memory_space<vmem>>, %arg4: memref<8x128xf32, #tpu.memory_space<vmem>>) attributes {dimension_semantics = [#tpu.dimension_semantics<parallel>], iteration_bounds = array<i64: 1>, scalar_prefetch = 0 : i64, scratch_operands = 0 : i64, tpu.core_type = #tpu.core_type<tc>, window_params = [{transform_indices = @transform_0, window_bounds = array<i64: 16, 128>}, {transform_indices = @transform_1, window_bounds = array<i64: 16, 128>}, {transform_indices = @transform_2, window_bounds = array<i64: 16, 1>}, {transform_indices = @transform_3, window_bounds = array<i64: 8, 128>}]} {
    %c0 = arith.constant 0 : index
    %c0_0 = arith.constant 0 : index
    %0 = vector.load %arg1[%c0, %c0_0] : memref<16x128xf32, #tpu.memory_space<vmem>>, vector<16x128xf32>
    %c0_1 = arith.constant 0 : index
    %c0_2 = arith.constant 0 : index
    %1 = vector.load %arg2[%c0_1, %c0_2] : memref<16x128xf32, #tpu.memory_space<vmem>>, vector<16x128xf32>
    %c0_3 = arith.constant 0 : index
    %c0_4 = arith.constant 0 : index
    %2 = vector.load %arg3[%c0_3, %c0_4] : memref<16x1xi32, #tpu.memory_space<vmem>>, vector<16x1xi32>
    %3 = tpu.iota {dimensions = array<i32: 0>} : vector<16x1xi32>
    %c16_i32 = arith.constant 16 : i32
    %4 = arith.muli %arg0, %c16_i32 : i32
    %5 = vector.broadcast %4 : i32 to vector<16x1xi32>
    %6 = arith.addi %5, %3 : vector<16x1xi32>
    %c16_i32_5 = arith.constant 16 : i32
    %7 = vector.broadcast %c16_i32_5 : i32 to vector<16x1xi32>
    %8 = arith.cmpi slt, %6, %7 : vector<16x1xi32>
    %cst = arith.constant 5.000000e-01 : f32
    %9 = vector.broadcast %cst : f32 to vector<16x128xf32>
    %10 = arith.mulf %0, %9 : vector<16x128xf32>
    %cst_6 = arith.constant 5.000000e-01 : f32
    %11 = vector.broadcast %cst_6 : f32 to vector<16x128xf32>
    %12 = arith.mulf %1, %11 : vector<16x128xf32>
    %cst_7 = arith.constant dense<0xFF800000> : vector<16xf32>
    %13 = vector.multi_reduction <maximumf>, %10, %cst_7 [1] : vector<16x128xf32> to vector<16xf32>
    %14 = vector.shape_cast %13 : vector<16xf32> to vector<16x1xf32>
    %15 = vector.broadcast %14 : vector<16x1xf32> to vector<16x128xf32>
    %16 = arith.subf %10, %15 : vector<16x128xf32>
    %17 = math.exp %16 : vector<16x128xf32>
    %cst_8 = arith.constant dense<0.000000e+00> : vector<16xf32>
    %18 = vector.multi_reduction <add>, %17, %cst_8 [1] : vector<16x128xf32> to vector<16xf32>
    %19 = vector.shape_cast %18 : vector<16xf32> to vector<16x1xf32>
    %20 = vector.broadcast %14 : vector<16x1xf32> to vector<16x128xf32>
    %21 = arith.subf %10, %20 : vector<16x128xf32>
    %22 = math.log %19 : vector<16x1xf32>
    %23 = vector.broadcast %22 : vector<16x1xf32> to vector<16x128xf32>
    %24 = arith.subf %21, %23 : vector<16x128xf32>
    %cst_9 = arith.constant dense<0xFF800000> : vector<16xf32>
    %25 = vector.multi_reduction <maximumf>, %12, %cst_9 [1] : vector<16x128xf32> to vector<16xf32>
    %26 = vector.shape_cast %25 : vector<16xf32> to vector<16x1xf32>
    %27 = vector.broadcast %26 : vector<16x1xf32> to vector<16x128xf32>
    %28 = arith.subf %12, %27 : vector<16x128xf32>
    %29 = math.exp %28 : vector<16x128xf32>
    %cst_10 = arith.constant dense<0.000000e+00> : vector<16xf32>
    %30 = vector.multi_reduction <add>, %29, %cst_10 [1] : vector<16x128xf32> to vector<16xf32>
    %31 = vector.shape_cast %30 : vector<16xf32> to vector<16x1xf32>
    %32 = vector.broadcast %26 : vector<16x1xf32> to vector<16x128xf32>
    %33 = arith.subf %12, %32 : vector<16x128xf32>
    %34 = math.log %31 : vector<16x1xf32>
    %35 = vector.broadcast %34 : vector<16x1xf32> to vector<16x128xf32>
    %36 = arith.subf %33, %35 : vector<16x128xf32>
    %cst_11 = arith.constant 1.000000e+00 : f32
    %37 = vector.broadcast %cst_11 : f32 to vector<16x1xf32>
    %38 = arith.divf %37, %31 : vector<16x1xf32>
    %39 = vector.broadcast %38 : vector<16x1xf32> to vector<16x128xf32>
    %40 = arith.mulf %29, %39 : vector<16x128xf32>
    %41 = arith.subf %36, %24 : vector<16x128xf32>
    %42 = arith.mulf %40, %41 : vector<16x128xf32>
    %cst_12 = arith.constant dense<0.000000e+00> : vector<16xf32>
    %43 = vector.multi_reduction <add>, %42, %cst_12 [1] : vector<16x128xf32> to vector<16xf32>
    %44 = vector.shape_cast %43 : vector<16xf32> to vector<16x1xf32>
    %cst_13 = arith.constant 2.000000e+00 : f32
    %45 = vector.broadcast %cst_13 : f32 to vector<16x1xf32>
    %46 = arith.mulf %45, %14 : vector<16x1xf32>
    %47 = arith.mulf %17, %17 : vector<16x128xf32>
    %cst_14 = arith.constant dense<0.000000e+00> : vector<16xf32>
    %48 = vector.multi_reduction <add>, %47, %cst_14 [1] : vector<16x128xf32> to vector<16xf32>
    %49 = vector.shape_cast %48 : vector<16xf32> to vector<16x1xf32>
    %50 = math.log %49 : vector<16x1xf32>
    %51 = arith.addf %50, %46 : vector<16x1xf32>
    %52 = tpu.iota {dimensions = array<i32: 1>} : vector<16x128xi32>
    %53 = vector.broadcast %2 : vector<16x1xi32> to vector<16x128xi32>
    %54 = arith.cmpi eq, %52, %53 : vector<16x128xi32>
    %cst_15 = arith.constant 0.000000e+00 : f32
    %55 = vector.broadcast %cst_15 : f32 to vector<16x128xf32>
    %56 = arith.select %54, %0, %55 : vector<16x128xi1>, vector<16x128xf32>
    %cst_16 = arith.constant dense<0.000000e+00> : vector<16xf32>
    %57 = vector.multi_reduction <add>, %56, %cst_16 [1] : vector<16x128xf32> to vector<16xf32>
    %58 = vector.shape_cast %57 : vector<16xf32> to vector<16x1xf32>
    %59 = arith.subf %51, %58 : vector<16x1xf32>
    %cst_17 = arith.constant 0.000000e+00 : f32
    %60 = vector.broadcast %cst_17 : f32 to vector<16x1xf32>
    %61 = arith.select %8, %44, %60 : vector<16x1xi1>, vector<16x1xf32>
    %62 = vector.shape_cast %61 : vector<16x1xf32> to vector<1x16x1xf32>
    %cst_18 = arith.constant dense<0.000000e+00> : vector<1xf32>
    %63 = vector.multi_reduction <add>, %62, %cst_18 [1, 2] : vector<1x16x1xf32> to vector<1xf32>
    %64 = vector.shape_cast %63 : vector<1xf32> to vector<1x1x1xf32>
    %65 = vector.extract %64[0, 0, 0] : f32 from vector<1x1x1xf32>
    %cst_19 = arith.constant 0.000000e+00 : f32
    %66 = vector.broadcast %cst_19 : f32 to vector<16x1xf32>
    %67 = arith.select %8, %59, %66 : vector<16x1xi1>, vector<16x1xf32>
    %68 = vector.shape_cast %67 : vector<16x1xf32> to vector<1x16x1xf32>
    %cst_20 = arith.constant dense<0.000000e+00> : vector<1xf32>
    %69 = vector.multi_reduction <add>, %68, %cst_20 [1, 2] : vector<1x16x1xf32> to vector<1xf32>
    %70 = vector.shape_cast %69 : vector<1xf32> to vector<1x1x1xf32>
    %71 = vector.extract %70[0, 0, 0] : f32 from vector<1x1x1xf32>
    %72 = tpu.iota {dimensions = array<i32: 1>} : vector<8x128xi32>
    %c0_i32 = arith.constant 0 : i32
    %73 = vector.broadcast %c0_i32 : i32 to vector<8x128xi32>
    %74 = arith.cmpi eq, %72, %73 : vector<8x128xi32>
    %c1_i32 = arith.constant 1 : i32
    %75 = vector.broadcast %c1_i32 : i32 to vector<8x128xi32>
    %76 = arith.cmpi eq, %72, %75 : vector<8x128xi32>
    %cst_21 = arith.constant 0.000000e+00 : f32
    %77 = vector.broadcast %71 : f32 to vector<8x128xf32>
    %78 = vector.broadcast %cst_21 : f32 to vector<8x128xf32>
    %79 = arith.select %76, %77, %78 : vector<8x128xi1>, vector<8x128xf32>
    %80 = vector.broadcast %65 : f32 to vector<8x128xf32>
    %81 = arith.select %74, %80, %79 : vector<8x128xi1>, vector<8x128xf32>
    %c0_22 = arith.constant 0 : index
    %c0_23 = arith.constant 0 : index
    %82 = vector.load %arg4[%c0_22, %c0_23] : memref<8x128xf32, #tpu.memory_space<vmem>>, vector<8x128xf32>
    tpu.vector_store %arg4[%c0_22, %c0_23], %81 {strides = array<i32>} : memref<8x128xf32, #tpu.memory_space<vmem>>, vector<8x128xf32>,
    return
  }
  func.func @transform_0(%arg0: i32) -> (i32, i32) {
    %c0_i32 = arith.constant 0 : i32
    %c0_i32_0 = arith.constant 0 : i32
    return %arg0, %c0_i32 : i32, i32
  }
  func.func @transform_1(%arg0: i32) -> (i32, i32) {
    %c0_i32 = arith.constant 0 : i32
    %c0_i32_0 = arith.constant 0 : i32
    return %arg0, %c0_i32 : i32, i32
  }
  func.func @transform_2(%arg0: i32) -> (i32, i32) {
    %c0_i32 = arith.constant 0 : i32
    %c0_i32_0 = arith.constant 0 : i32
    return %arg0, %c0_i32 : i32, i32
  }
  func.func @transform_3(%arg0: i32) -> (i32, i32) {
    %c0_i32 = arith.constant 0 : i32
    %c0_i32_0 = arith.constant 0 : i32
    return %arg0, %c0_i32 : i32, i32
  }
}

</mosaic_0001>

<bundles_post_ra>
// kernel: tpu_custom_call.1
= control target key start
LH: loop header
LB: loop body
LE: loop exit
PB: predicated region body
PF: predicated region fallthrough
CT: control target
= control target key end

     0   :  { %8 = vsyncpa [#allocation3], 0  ;;  %s359_s0 = inlined_call_operand.vmem [shape: f32[16,128], index: 0, kind: input, shape index: {}]   ;;  %s360_s1 = inlined_call_operand.hbm [shape: f32[16,128], index: 1, kind: input, shape index: {}]   ;;  %s361_s2 = inlined_call_operand.vmem [shape: s32[16,1], index: 2, kind: input, shape index: {}]   ;;  %s362_s3 = inlined_call_operand.hbm [shape: f32[8,128], index: 3, kind: output, shape index: {}]  }
   0x1   :  { %9 = vsyncpa [#allocation4], 0  ;;  %s268_s12 = smov [#allocation2]   ;;  %s220_s16 = scalar_lea.hbm %s360_s1, 256 }
   0x2   :  { %s17_s13 = sshll.u32 %s268_s12, 4  ;;  %p221_p0 = scmp.ne.s32.totalorder %s360_s1, %s220_s16  ;;  %s18_s13 = int_to_ptr.vmem [resolvable:$true] %s17_s13 }
   0x3   :  { %p224_p1 = scmp.lt.u32.totalorder %s220_s16, %s360_s1 }
   0x5   :  { %p226_p2 = pnand %p224_p1, %p221_p0 }
   0x7   :  { %229 = shalt.err (!%p226_p2)
}
   0x8   :  { %s230_s21 = scalar_lea.vmem %s18_s13, 256  ;;  %p235_p4 = scmp.lt.s32.totalorder %s18_s13, %s18_s13 }
   0x9   :  { %p231_p3 = scmp.ne.s32.totalorder %s18_s13, %s230_s21  ;;  %p236_p5 = scmp.lt.s32.totalorder %s230_s21, %s230_s21 }
   0xb   :  { %p237_p6 = por %p236_p5, %p235_p4 }
   0xd   :  { %p238_p7 = pnand %p237_p6, %p231_p3 }
   0xf   :  { %241 = shalt.err (!%p238_p7)
}
  0x10   :  { %s269_s22 = smov 128   ;;  %s270_s23 = smov 8  }
  0x11   :  { %23 = dma.hbm_to_vmem [thread:$0]  %s360_s1, 256, %s18_s13, [#allocation3], %s269_s22, %s269_s22, %s270_s23  }
  0x12   :  { %264 = dma.done.wait [#allocation3], 256  }
  0x13   :  { %265 = vsyncadd [#allocation3], 4294967040  ;;  %v308_v0 = vld [vmem:[%s359_s0] sm:$0xff]  ;;  %v313_v2 = vld [vmem:[%s359_s0 + $0x8] sm:$0xff]  ;;  %v271_v8 = vmov 0   ;;  %v116_v32 = vlaneseq  ;;  %vm136_vm2 = vcmask 7168  }
  0x14   :  { %v31_v1 = vld [vmem:[#allocation2] sm:$0xff]  ;;  %v44_v3 = vmul.f32 0.5, %v308_v0  ;;  %v32_v5 = vld [vmem:[#allocation2 + $0x8] sm:$0xff]  ;;  %v45_v6 = vmul.f32 0.5, %v313_v2  ;;  %195 = vset.pattern.permute.xlu1 %v271_v8  ;;  %194 = vset.pattern.permute.xlu0 %v271_v8  ;;  %s272_s5 = smov [#allocation5]  }
  0x15   :  { %v46_v4 = vmul.f32 0.5, %v31_v1  ;;  %v47_v7 = vmul.f32 0.5, %v32_v5  ;;  %v34_v25 = vld [vmem:[%s361_s2 + $0x8] sm:$0xff]  ;;  %v33_v26 = vld [vmem:[%s361_s2] sm:$0xff]  ;;  %v335_v34 = vand.u32 127, %v116_v32  ;;  %s176_s6 = sshll.u32 %s272_s5, 4  ;;  %s177_s6 = int_to_ptr.vmem [resolvable:$true] %s176_s6 }
  0x16   :  { %48 = vmax.xlane.f32.xlu0 %v44_v3  ;;  %s242_s8 = scalar_lea.vmem %s177_s6, 128  ;;  %p247_p9 = scmp.lt.s32.totalorder %s177_s6, %s177_s6 }
  0x17   :  { %68 = vmax.xlane.f32.xlu1 %v46_v4  ;;  %vm164_vm3 = vcmp.eq.s32.totalorder %v335_v34, 1  ;;  %vm163_vm4 = vcmp.eq.s32.totalorder %v335_v34, 0  ;;  %p243_p8 = scmp.ne.s32.totalorder %s177_s6, %s242_s8  ;;  %p248_p10 = scmp.lt.s32.totalorder %s242_s8, %s242_s8 }
  0x19   :  { %p249_p11 = por %p248_p10, %p247_p9 }
  0x1a   :  { %50 = vmax.xlane.f32.xlu0 %v45_v6 }
  0x1b   :  { %70 = vmax.xlane.f32.xlu1 %v47_v7  ;;  %p250_p12 = pnand %p249_p11, %p243_p8 }
  0xa3   :  { %v317_v9 = vpop.xlane.xlu0 %48 }
  0xa4   :  { %v69_v10 = vpop.xlane.xlu1 %68  ;;  %v320_v11 = vsub.f32 %v44_v3, %v317_v9  ;;  %v102_v5 = vmul.f32 2.0, %v317_v9 }
  0xa5   :  { %v322_v12 = vsub.f32 %v46_v4, %v69_v10 }
  0xa6   :  { %v54_v13 = vmul.f32 1.442695, %v320_v11 }
  0xa7   :  { %v74_v14 = vmul.f32 1.442695, %v322_v12  ;;  %v326_v15 = vpop.xlane.xlu0 %50 }
  0xa8   :  { %v71_v16 = vpop.xlane.xlu1 %70  ;;  %196 = vpow2.f32 %v54_v13  ;;  %v53_v17 = vsub.f32 %v45_v6, %v326_v15 }
  0xa9   :  { %v73_v18 = vsub.f32 %v47_v7, %v71_v16  ;;  %198 = vpow2.f32 %v74_v14 }
  0xaa   :  { %v56_v19 = vmul.f32 1.442695, %v53_v17 }
  0xab   :  { %v76_v20 = vmul.f32 1.442695, %v73_v18 }
  0xac   :  { %200 = vpow2.f32 %v56_v19 }
  0xad   :  { %202 = vpow2.f32 %v76_v20 }
  0xb2   :  { %v197_v21 = vpop.eup %196 }
  0xb3   :  { %58 = vadd.xlane.f32.xlu0 %v197_v21  ;;  %v199_v22 = vpop.eup %198  ;;  %v104_v28 = vmul.f32 %v197_v21, %v197_v21 }
  0xb6   :  { %v201_v23 = vpop.eup %200 }
  0xb7   :  { %78 = vadd.xlane.f32.xlu0 %v199_v22  ;;  %60 = vadd.xlane.f32.xlu1 %v201_v23  ;;  %v203_v24 = vpop.eup %202  ;;  %v105_v27 = vmul.f32 %v201_v23, %v201_v23 }
  0xbb   :  { %80 = vadd.xlane.f32.xlu1 %v203_v24 }
  0xcc   :  { %122 = vperm.xlu1 %195, %v34_v25  }
  0xcd   :  { %119 = vperm.xlu0 %194, %v33_v26  }
  0xec   :  { %108 = vadd.xlane.f32.xlu0 %v105_v27 }
  0xf0   :  { %106 = vadd.xlane.f32.xlu1 %v104_v28 }
 0x140   :  { %v59_v29 = vpop.xlane.xlu0 %58 }
 0x141   :  { %204 = vlog2.f32 %v59_v29 }
 0x144   :  { %v61_v30 = vpop.xlane.xlu1 %60  ;;  %v79_v31 = vpop.xlane.xlu0 %78 }
 0x145   :  { %206 = vlog2.f32 %v61_v30 }
 0x146   :  { %208 = vlog2.f32 %v79_v31 }
 0x147   :  { %210 = vrcp.f32 %v79_v31 }
 0x148   :  { %v81_v33 = vpop.xlane.xlu1 %80 }
 0x149   :  { %212 = vlog2.f32 %v81_v33 }
 0x14a   :  { %214 = vrcp.f32 %v81_v33 }
 0x14b   :  { %v205_v35 = vpop.eup %204 }
 0x14c   :  { %v120_v36 = vpop.permute.xlu0 %119  ;;  %v123_v37 = vpop.permute.xlu1 %122  ;;  %v63_v40 = vmul.f32 0.6931472, %v205_v35 }
 0x14d   :  { %vm124_vm0 = vcmp.eq.s32.totalorder %v335_v34, %v120_v36  ;;  %vm125_vm1 = vcmp.eq.s32.totalorder %v335_v34, %v123_v37 }
 0x14e   :  { %v126_v38 = vsel %vm124_vm0, %v308_v0, 0.0  ;;  %v127_v42 = vsel %vm125_vm1, %v313_v2, 0.0  ;;  %v66_v47 = vsub.f32 %v320_v11, %v63_v40  ;;  %v103_v2 = vmul.f32 2.0, %v326_v15 }
 0x14f   :  { %v207_v39 = vpop.eup %206  ;;  %128 = vadd.xlane.f32.xlu1 %v126_v38 }
 0x150   :  { %v209_v41 = vpop.eup %208  ;;  %v65_v45 = vmul.f32 0.6931472, %v207_v39 }
 0x151   :  { %v83_v43 = vmul.f32 0.6931472, %v209_v41  ;;  %v211_v44 = vpop.eup %210 }
 0x152   :  { %v92_v51 = vmul.f32 %v211_v44, %v199_v22  ;;  %v67_v53 = vsub.f32 %v53_v17, %v65_v45 }
 0x153   :  { %v213_v46 = vpop.eup %212  ;;  %130 = vadd.xlane.f32.xlu1 %v127_v42  ;;  %v86_v48 = vsub.f32 %v322_v12, %v83_v43 }
 0x154   :  { %v85_v49 = vmul.f32 0.6931472, %v213_v46  ;;  %v215_v50 = vpop.eup %214 }
 0x155   :  { %v94_v52 = vsub.f32 %v86_v48, %v66_v47  ;;  %v93_v56 = vmul.f32 %v215_v50, %v203_v24 }
 0x156   :  { %v87_v54 = vsub.f32 %v73_v18, %v85_v49 }
 0x157   :  { %v96_v55 = vmul.f32 %v94_v52, %v92_v51 }
 0x158   :  { %v95_v57 = vsub.f32 %v87_v54, %v67_v53 }
 0x159   :  { %98 = vadd.xlane.f32.xlu1 %v96_v55 }
 0x15a   :  { %v97_v58 = vmul.f32 %v95_v57, %v93_v56 }
 0x15d   :  { %100 = vadd.xlane.f32.xlu1 %v97_v58 }
 0x179   :  { %v109_v59 = vpop.xlane.xlu0 %108 }
 0x17a   :  { %216 = vlog2.f32 %v109_v59 }
 0x17d   :  { %v107_v60 = vpop.xlane.xlu1 %106 }
 0x17e   :  { %218 = vlog2.f32 %v107_v60 }
 0x184   :  { %v217_v62 = vpop.eup %216 }
 0x185   :  { %v113_v1 = vmul.f32 0.6931472, %v217_v62 }
 0x187   :  { %v115_v6 = vadd.f32 %v113_v1, %v103_v2 }
 0x188   :  { %v219_v0 = vpop.eup %218 }
 0x189   :  { %v111_v3 = vmul.f32 0.6931472, %v219_v0 }
 0x18b   :  { %v114_v7 = vadd.f32 %v111_v3, %v102_v5 }
 0x1dc   :  { %v129_v61 = vpop.xlane.xlu1 %128 }
 0x1dd   :  { %v132_v11 = vsub.f32 %v114_v7, %v129_v61 }
 0x1df   :  { %v151_v17 = vsel %vm136_vm2, %v132_v11, 0.0 }
 0x1e0   :  { %v131_v63 = vpop.xlane.xlu1 %130 }
 0x1e1   :  { %v133_v8 = vsub.f32 %v115_v6, %v131_v63 }
 0x1e3   :  { %v152_v16 = vsel %vm136_vm2, %v133_v8, 0.0 }
 0x1e4   :  { %v153_v18 = vadd.f32 %v152_v16, %v151_v17 }
 0x1e6   :  { %v99_v4 = vpop.xlane.xlu1 %98 }
 0x1e7   :  { %v137_v12 = vsel %vm136_vm2, %v99_v4, 0.0 }
 0x1ea   :  { %v101_v10 = vpop.xlane.xlu1 %100 }
 0x1eb   :  { %v138_v13 = vsel %vm136_vm2, %v101_v10, 0.0 }
 0x1ec   :  { %v139_v14 = vadd.f32 %v138_v13, %v137_v12 }
 0x1ee   :  { %140 = vadd.xlane.f32.xlu1 %v139_v14 }
 0x1f2   :  { %154 = vadd.xlane.f32.xlu1 %v153_v18 }
 0x27b   :  { %v141_v19 = vpop.xlane.xlu1 %140 }
 0x27c   :  { %v142_v15 = vrot.slane %v141_v19, 4 }
 0x27e   :  { %v143_v20 = vadd.f32 %v142_v15, %v141_v19 }
 0x27f   :  { %v155_v21 = vpop.xlane.xlu1 %154 }
 0x280   :  { %v144_v22 = vrot.slane %v143_v20, 2  ;;  %v156_v9 = vrot.slane %v155_v21, 4 }
 0x282   :  { %v157_v23 = vadd.f32 %v156_v9, %v155_v21  ;;  %v145_v24 = vadd.f32 %v144_v22, %v143_v20 }
 0x284   :  { %v158_v25 = vrot.slane %v157_v23, 2  ;;  %v146_v26 = vrot.slane %v145_v24, 1 }
 0x286   :  { %v159_v27 = vadd.f32 %v158_v25, %v157_v23  ;;  %v147_v28 = vadd.f32 %v146_v26, %v145_v24 }
 0x288   :  { %185 = vpush %v147_v28  ;;  %v160_v29 = vrot.slane %v159_v27, 1 }
 0x28a   :  { %v161_v30 = vadd.f32 %v160_v29, %v159_v27 }
 0x28c   :  { %187 = vpush %v161_v30 }
 0x2b9   :  { %s186_s2 = spop %185 }
 0x2ba   :  { %v167_v32 = vstv %s186_s2 }
 0x2bd   :  { %s188_s7 = spop %187 }
 0x2be   :  { %v165_v31 = vstv %s188_s7 }
 0x2bf   :  { %v166_v33 = vsel %vm164_vm3, %v165_v31, 0.0 }
 0x2c0   :  { %v168_v35 = vsel %vm163_vm4, %v167_v32, %v166_v33 }
 0x2c1   :  { %169 = vst [vmem:[#allocation5] sm:$0xff] %v168_v35 }
 0x2c2   :  { %253 = shalt.err (!%p250_p12)
}
 0x2c3   :  { %s254_s11 = scalar_lea.hbm %s362_s3, 128 }
 0x2c4   :  { %p255_p13 = scmp.ne.s32.totalorder %s362_s3, %s254_s11  ;;  %p258_p0 = scmp.lt.u32.totalorder %s254_s11, %s362_s3 }
 0x2c6   :  { %p260_p1 = pnand %p258_p0, %p255_p13 }
 0x2c8   :  { %263 = shalt.err (!%p260_p1)
}
 0x2c9   :  { %179 = dma.vmem_to_hbm [thread:$0]  %s177_s6, 128, %s362_s3, [#allocation4]  }
 0x2ca   :  { %266 = dma.done.wait [#allocation4], 128  }
 0x2cb   :  { %267 = vsyncadd [#allocation4], 4294967168 }
 0x2cc   :  { %183 = vsyncpa [#allocation3], 1 }
 0x2cd   :  { %184 = vsyncpa [#allocation4], 1 }

</bundles_post_ra>
